<compile_context>
chip_gen: v6e
topology: v6e:2x2x1
jax: 0.10.0
libtpu: 0.0.40
codegen_flags: <defaults>
</compile_context>

<pallas_src>
import functools

import jax
import jax.numpy as jnp
import numpy as np
from jax.experimental import pallas as pl
from jax.experimental.pallas import tpu as pltpu

LN_EPS = 1e-5


def _round_up(n, m):
    return ((n + m - 1) // m) * m


def _mlp_kernel(x_ref, p_ref, o_ref):
    """Fused feature-major MLP: [Linear -> LayerNorm -> ReLU] x2 -> Linear -> Tanh.

    Batch runs along the 128-lane axis; features along sublanes.
      x_ref : (IN, TB)          f32   input tile (batch columns)
      p_ref : (H, IN + 2H + 7)  f32   [w1t | w2t | w3t(row-padded) | b1 g1 be1 b2 g2 be2 b3]
      o_ref : (OUT, TB)         f32   lane-dense output tile
    """
    in_dim = x_ref.shape[0]
    hidden = p_ref.shape[0]
    out_dim = o_ref.shape[0]

    p = p_ref[...]                                   # tiny, resident in VMEM
    w1 = p[:, 0:in_dim]                              # (H, IN)
    w2 = p[:, in_dim:in_dim + hidden]                # (H, H)
    w3 = p[:, in_dim + hidden:in_dim + 2 * hidden]   # (H, H), rows >= OUT are zero
    c = in_dim + 2 * hidden
    b1, g1, be1 = p[:, c + 0:c + 1], p[:, c + 1:c + 2], p[:, c + 2:c + 3]
    b2, g2, be2 = p[:, c + 3:c + 4], p[:, c + 4:c + 5], p[:, c + 5:c + 6]
    b3 = p[:out_dim, c + 6:c + 7]                    # (OUT, 1)

    def hidden_layer(h, w, b, g, be):
        # Linear on the MXU: (H, K) @ (K, TB), f32 accumulate. Bias broadcasts
        # along lanes (batch).
        h = jnp.dot(w, h, preferred_element_type=jnp.float32) + b
        # LayerNorm over the feature (sublane) axis — two-pass, torch-style.
        mu = jnp.mean(h, axis=0, keepdims=True)                  # (1, TB)
        var = jnp.mean(jnp.square(h - mu), axis=0, keepdims=True)
        h = (h - mu) * jax.lax.rsqrt(var + LN_EPS) * g + be
        return jnp.maximum(h, 0.0)                               # ReLU

    h = hidden_layer(x_ref[...], w1, b1, g1, be1)
    h = hidden_layer(h, w2, b2, g2, be2)

    # Output Linear (rows >= OUT of w3 are zero weights) + tanh on the OUT
    # rows only, stored lane-dense.
    out = jnp.dot(w3, h, preferred_element_type=jnp.float32)     # (H, TB)
    o_ref[...] = jnp.tanh(out[:out_dim, :] + b3).astype(o_ref.dtype)


def pack_params(params):
    """Pack all 10 parameter tensors into ONE f32 slab (call once, not per step).

    Slab layout (feature-major): columns = [w1.T | w2.T | w3.T (rows padded to
    hidden) | b1 | g1 | be1 | b2 | g2 | be2 | b3 (padded)], shape (H, IN+2H+7).
    """
    w1 = jnp.asarray(params["w1"], jnp.float32)
    w2 = jnp.asarray(params["w2"], jnp.float32)
    w3 = jnp.asarray(params["w3"], jnp.float32)
    in_dim, hidden = w1.shape
    out_dim = w3.shape[1]
    w3t = jnp.zeros((hidden, hidden), jnp.float32).at[:out_dim, :].set(w3.T)

    def col(name):
        v = jnp.asarray(params[name], jnp.float32).reshape(-1, 1)
        return jnp.pad(v, ((0, hidden - v.shape[0]), (0, 0)))

    slab = jnp.concatenate(
        [w1.T, w2.T, w3t,
         col("b1"), col("g1"), col("be1"),
         col("b2"), col("g2"), col("be2"), col("b3")],
        axis=1)                                      # (H, IN + 2H + 7) f32
    return slab, out_dim


def _choose_tile(batch, block_cols):
    """Batch-column tile (multiple of 128 lanes)."""
    block_cols = max(128, _round_up(block_cols, 128))
    pmin = _round_up(batch, 128)
    tb = min(block_cols, pmin)
    # v7x megacore: for large batches make sure the "parallel" batch axis has
    # >= 2 grid steps so both TensorCores get work (harmless on v5e/v6e).
    if pmin >= 1024 and pmin <= tb:
        tb = _round_up((pmin + 1) // 2, 128)
    return tb


@functools.partial(jax.jit, static_argnames=("out_dim", "block_cols"))
def mlp_forward(x, p_slab, *, out_dim, block_cols=8192):
    """x: (batch, input_dim) f32; p_slab: packed params from pack_params()."""
    batch, in_dim = x.shape
    hidden = p_slab.shape[0]
    assert p_slab.shape[1] == in_dim + 2 * hidden + 7

    tb = _choose_tile(batch, block_cols)
    padded = _round_up(batch, tb)

    # Layout plumbing only: batch onto the lane axis; pad only if needed.
    xt = x.T                                         # (in_dim, batch) f32
    if padded != batch:
        xt = jnp.pad(xt, ((0, 0), (0, padded - batch)))

    grid = (padded // tb,)
    out_t = pl.pallas_call(
        _mlp_kernel,
        out_shape=jax.ShapeDtypeStruct((out_dim, padded), jnp.float32),
        grid=grid,
        in_specs=[
            pl.BlockSpec((in_dim, tb), lambda i: (0, i)),
            # Parameter slab: constant block index -> stays resident in VMEM.
            pl.BlockSpec(p_slab.shape, lambda i: (0, 0)),
        ],
        out_specs=pl.BlockSpec((out_dim, tb), lambda i: (0, i)),
        compiler_params=pltpu.CompilerParams(
            dimension_semantics=("parallel",)),
    )(xt, p_slab)
    return out_t[:, :batch].T                        # (batch, out_dim)


def init_params(key, input_dim, hidden_dims, output_dim):
    """Deterministic init mirroring the PyTorch module's __init__."""
    dims = [input_dim] + list(hidden_dims) + [output_dim]
    params = {}
    keys = jax.random.split(key, 2 * (len(dims) - 1))
    for i in range(len(dims) - 1):
        fan_in, fan_out = dims[i], dims[i + 1]
        kw, kb = keys[2 * i], keys[2 * i + 1]
        if i < len(dims) - 2:
            # nn.init.xavier_uniform_ weight, zeros bias.
            a = float(np.sqrt(6.0 / (fan_in + fan_out)))
            w = jax.random.uniform(kw, (fan_in, fan_out), jnp.float32, -a, a)
            b = jnp.zeros((1, fan_out), jnp.float32)
            # LayerNorm affine params (default init: gamma=1, beta=0).
            params[f"g{i + 1}"] = jnp.ones((1, fan_out), jnp.float32)
            params[f"be{i + 1}"] = jnp.zeros((1, fan_out), jnp.float32)
        else:
            # Default nn.Linear init: kaiming_uniform(a=sqrt(5)) w, uniform b.
            bound = float(1.0 / np.sqrt(fan_in))
            w = jax.random.uniform(kw, (fan_in, fan_out), jnp.float32, -bound, bound)
            b = jax.random.uniform(kb, (1, fan_out), jnp.float32, -bound, bound)
        params[f"w{i + 1}"] = w
        params[f"b{i + 1}"] = b
    return params


def mlp_reference(x, p):
    """Pure-JAX f32 reference matching the PyTorch module (full-precision dots)."""
    hi = jax.lax.Precision.HIGHEST

    def hid(h, w, b, g, be):
        h = jnp.dot(h, w, precision=hi) + b
        mu = jnp.mean(h, axis=-1, keepdims=True)
        var = jnp.mean(jnp.square(h - mu), axis=-1, keepdims=True)
        h = (h - mu) / jnp.sqrt(var + LN_EPS) * g + be
        return jnp.maximum(h, 0.0)

    h = hid(x, p["w1"], p["b1"], p["g1"], p["be1"])
    h = hid(h, p["w2"], p["b2"], p["g2"], p["be2"])
    return jnp.tanh(jnp.dot(h, p["w3"], precision=hi) + p["b3"])


if __name__ == "__main__":
    # TODO(synk): dropout > 0 (train-mode stochastic masking) not implemented;
    # this config uses dropout=0.0 so forward semantics are unchanged.
    input_dim, hidden_dims, output_dim = 16, [32, 32], 8

    key = jax.random.PRNGKey(0)
    k_x, k_p = jax.random.split(key)
    params = init_params(k_p, input_dim, hidden_dims, output_dim)
    # Pack once, outside the hot path (review: no per-call concat/pad launches).
    p_slab, out_dim = pack_params(params)

    batch = 2
    x = jax.random.normal(k_x, (batch, input_dim), jnp.float32)
    out = jax.block_until_ready(mlp_forward(x, p_slab, out_dim=out_dim))
    ref = mlp_reference(x, params)
    # Both sides are f32; observed mismatch is ~1e-6.  The looser bound only
    # guards against matmul lowerings that internally use bf16 passes.
    np.testing.assert_allclose(np.asarray(out), np.asarray(ref),
                               rtol=2e-2, atol=2e-2)

    # Larger, non-tile-aligned batch exercises the multi-step (megacore-
    # splittable) grid path and the ragged-tile padding.
    x_big = jax.random.normal(k_x, (1000, input_dim), jnp.float32)
    out_big = jax.block_until_ready(mlp_forward(x_big, p_slab, out_dim=out_dim))
    ref_big = mlp_reference(x_big, params)
    np.testing.assert_allclose(np.asarray(out_big), np.asarray(ref_big),
                               rtol=2e-2, atol=2e-2)

    print("KERNEL_OK")
</pallas_src>

<mosaic_0001>
module attributes {stable_mosaic.version = 11 : i64} {
  func.func @_mlp_kernel(%arg0: i32, %arg1: memref<16x128xf32, #tpu.memory_space<vmem>>, %arg2: memref<32x87xf32, #tpu.memory_space<vmem>>, %arg3: memref<8x128xf32, #tpu.memory_space<vmem>>) attributes {dimension_semantics = [#tpu.dimension_semantics<parallel>], iteration_bounds = array<i64: 1>, scalar_prefetch = 0 : i64, scratch_operands = 0 : i64, tpu.core_type = #tpu.core_type<tc>, window_params = [{transform_indices = @transform_0, window_bounds = array<i64: 16, 128>}, {pipeline_mode = #tpu.pipeline_mode<synchronous>, transform_indices = @transform_1, window_bounds = array<i64: 32, 87>}, {transform_indices = @transform_2, window_bounds = array<i64: 8, 128>}]} {
    %c0 = arith.constant 0 : index
    %c0_0 = arith.constant 0 : index
    %0 = vector.load %arg2[%c0, %c0_0] : memref<32x87xf32, #tpu.memory_space<vmem>>, vector<32x87xf32>
    %1 = vector.extract_strided_slice %0 {offsets = [0, 0], sizes = [32, 16], strides = [1, 1]} : vector<32x87xf32> to vector<32x16xf32>
    %2 = vector.extract_strided_slice %0 {offsets = [0, 16], sizes = [32, 32], strides = [1, 1]} : vector<32x87xf32> to vector<32x32xf32>
    %3 = vector.extract_strided_slice %0 {offsets = [0, 48], sizes = [32, 32], strides = [1, 1]} : vector<32x87xf32> to vector<32x32xf32>
    %4 = vector.extract_strided_slice %0 {offsets = [0, 80], sizes = [32, 1], strides = [1, 1]} : vector<32x87xf32> to vector<32x1xf32>
    %5 = vector.extract_strided_slice %0 {offsets = [0, 81], sizes = [32, 1], strides = [1, 1]} : vector<32x87xf32> to vector<32x1xf32>
    %6 = vector.extract_strided_slice %0 {offsets = [0, 82], sizes = [32, 1], strides = [1, 1]} : vector<32x87xf32> to vector<32x1xf32>
    %7 = vector.extract_strided_slice %0 {offsets = [0, 83], sizes = [32, 1], strides = [1, 1]} : vector<32x87xf32> to vector<32x1xf32>
    %8 = vector.extract_strided_slice %0 {offsets = [0, 84], sizes = [32, 1], strides = [1, 1]} : vector<32x87xf32> to vector<32x1xf32>
    %9 = vector.extract_strided_slice %0 {offsets = [0, 85], sizes = [32, 1], strides = [1, 1]} : vector<32x87xf32> to vector<32x1xf32>
    %10 = vector.extract_strided_slice %0 {offsets = [0, 86], sizes = [8, 1], strides = [1, 1]} : vector<32x87xf32> to vector<8x1xf32>
    %c0_1 = arith.constant 0 : index
    %c0_2 = arith.constant 0 : index
    %11 = vector.load %arg1[%c0_1, %c0_2] : memref<16x128xf32, #tpu.memory_space<vmem>>, vector<16x128xf32>
    %cst = arith.constant dense<0.000000e+00> : vector<32x128xf32>
    %12 = tpu.matmul %1, %11, %cst {dimension_numbers = #tpu.dot_dimension_numbers<[1], [0], [0], [1], [0, 0, 1, 1], [], []>} : vector<32x16xf32>, vector<16x128xf32>, vector<32x128xf32> -> vector<32x128xf32>
    %13 = vector.broadcast %4 : vector<32x1xf32> to vector<32x128xf32>
    %14 = arith.addf %12, %13 : vector<32x128xf32>
    %cst_3 = arith.constant dense<0.000000e+00> : vector<128xf32>
    %15 = vector.multi_reduction <add>, %14, %cst_3 [0] : vector<32x128xf32> to vector<128xf32>
    %16 = vector.shape_cast %15 : vector<128xf32> to vector<1x128xf32>
    %cst_4 = arith.constant 3.200000e+01 : f32
    %17 = vector.broadcast %cst_4 : f32 to vector<1x128xf32>
    %18 = arith.divf %16, %17 : vector<1x128xf32>
    %19 = vector.broadcast %18 : vector<1x128xf32> to vector<32x128xf32>
    %20 = arith.subf %14, %19 : vector<32x128xf32>
    %21 = arith.mulf %20, %20 : vector<32x128xf32>
    %cst_5 = arith.constant dense<0.000000e+00> : vector<128xf32>
    %22 = vector.multi_reduction <add>, %21, %cst_5 [0] : vector<32x128xf32> to vector<128xf32>
    %23 = vector.shape_cast %22 : vector<128xf32> to vector<1x128xf32>
    %cst_6 = arith.constant 3.200000e+01 : f32
    %24 = vector.broadcast %cst_6 : f32 to vector<1x128xf32>
    %25 = arith.divf %23, %24 : vector<1x128xf32>
    %26 = vector.broadcast %18 : vector<1x128xf32> to vector<32x128xf32>
    %27 = arith.subf %14, %26 : vector<32x128xf32>
    %cst_7 = arith.constant 9.99999974E-6 : f32
    %28 = vector.broadcast %cst_7 : f32 to vector<1x128xf32>
    %29 = arith.addf %25, %28 : vector<1x128xf32>
    %30 = math.rsqrt %29 : vector<1x128xf32>
    %31 = vector.broadcast %30 : vector<1x128xf32> to vector<32x128xf32>
    %32 = arith.mulf %27, %31 : vector<32x128xf32>
    %33 = vector.broadcast %5 : vector<32x1xf32> to vector<32x128xf32>
    %34 = arith.mulf %32, %33 : vector<32x128xf32>
    %35 = vector.broadcast %6 : vector<32x1xf32> to vector<32x128xf32>
    %36 = arith.addf %34, %35 : vector<32x128xf32>
    %cst_8 = arith.constant 0.000000e+00 : f32
    %37 = vector.broadcast %cst_8 : f32 to vector<32x128xf32>
    %38 = arith.maximumf %36, %37 : vector<32x128xf32>
    %cst_9 = arith.constant dense<0.000000e+00> : vector<32x128xf32>
    %39 = tpu.matmul %2, %38, %cst_9 {dimension_numbers = #tpu.dot_dimension_numbers<[1], [0], [0], [1], [0, 0, 1, 1], [], []>} : vector<32x32xf32>, vector<32x128xf32>, vector<32x128xf32> -> vector<32x128xf32>
    %40 = vector.broadcast %7 : vector<32x1xf32> to vector<32x128xf32>
    %41 = arith.addf %39, %40 : vector<32x128xf32>
    %cst_10 = arith.constant dense<0.000000e+00> : vector<128xf32>
    %42 = vector.multi_reduction <add>, %41, %cst_10 [0] : vector<32x128xf32> to vector<128xf32>
    %43 = vector.shape_cast %42 : vector<128xf32> to vector<1x128xf32>
    %cst_11 = arith.constant 3.200000e+01 : f32
    %44 = vector.broadcast %cst_11 : f32 to vector<1x128xf32>
    %45 = arith.divf %43, %44 : vector<1x128xf32>
    %46 = vector.broadcast %45 : vector<1x128xf32> to vector<32x128xf32>
    %47 = arith.subf %41, %46 : vector<32x128xf32>
    %48 = arith.mulf %47, %47 : vector<32x128xf32>
    %cst_12 = arith.constant dense<0.000000e+00> : vector<128xf32>
    %49 = vector.multi_reduction <add>, %48, %cst_12 [0] : vector<32x128xf32> to vector<128xf32>
    %50 = vector.shape_cast %49 : vector<128xf32> to vector<1x128xf32>
    %cst_13 = arith.constant 3.200000e+01 : f32
    %51 = vector.broadcast %cst_13 : f32 to vector<1x128xf32>
    %52 = arith.divf %50, %51 : vector<1x128xf32>
    %53 = vector.broadcast %45 : vector<1x128xf32> to vector<32x128xf32>
    %54 = arith.subf %41, %53 : vector<32x128xf32>
    %cst_14 = arith.constant 9.99999974E-6 : f32
    %55 = vector.broadcast %cst_14 : f32 to vector<1x128xf32>
    %56 = arith.addf %52, %55 : vector<1x128xf32>
    %57 = math.rsqrt %56 : vector<1x128xf32>
    %58 = vector.broadcast %57 : vector<1x128xf32> to vector<32x128xf32>
    %59 = arith.mulf %54, %58 : vector<32x128xf32>
    %60 = vector.broadcast %8 : vector<32x1xf32> to vector<32x128xf32>
    %61 = arith.mulf %59, %60 : vector<32x128xf32>
    %62 = vector.broadcast %9 : vector<32x1xf32> to vector<32x128xf32>
    %63 = arith.addf %61, %62 : vector<32x128xf32>
    %cst_15 = arith.constant 0.000000e+00 : f32
    %64 = vector.broadcast %cst_15 : f32 to vector<32x128xf32>
    %65 = arith.maximumf %63, %64 : vector<32x128xf32>
    %cst_16 = arith.constant dense<0.000000e+00> : vector<32x128xf32>
    %66 = tpu.matmul %3, %65, %cst_16 {dimension_numbers = #tpu.dot_dimension_numbers<[1], [0], [0], [1], [0, 0, 1, 1], [], []>} : vector<32x32xf32>, vector<32x128xf32>, vector<32x128xf32> -> vector<32x128xf32>
    %67 = vector.extract_strided_slice %66 {offsets = [0, 0], sizes = [8, 128], strides = [1, 1]} : vector<32x128xf32> to vector<8x128xf32>
    %68 = vector.broadcast %10 : vector<8x1xf32> to vector<8x128xf32>
    %69 = arith.addf %67, %68 : vector<8x128xf32>
    %70 = math.tanh %69 : vector<8x128xf32>
    %c0_17 = arith.constant 0 : index
    %c0_18 = arith.constant 0 : index
    %71 = vector.load %arg3[%c0_17, %c0_18] : memref<8x128xf32, #tpu.memory_space<vmem>>, vector<8x128xf32>
    tpu.vector_store %arg3[%c0_17, %c0_18], %70 {strides = array<i32>} : memref<8x128xf32, #tpu.memory_space<vmem>>, vector<8x128xf32>,
    return
  }
  func.func @transform_0(%arg0: i32) -> (i32, i32) {
    %c0_i32 = arith.constant 0 : i32
    %c0_i32_0 = arith.constant 0 : i32
    return %c0_i32, %arg0 : i32, i32
  }
  func.func @transform_1(%arg0: i32) -> (i32, i32) {
    %c0_i32 = arith.constant 0 : i32
    %c0_i32_0 = arith.constant 0 : i32
    %c0_i32_1 = arith.constant 0 : i32
    return %c0_i32, %c0_i32_0 : i32, i32
  }
  func.func @transform_2(%arg0: i32) -> (i32, i32) {
    %c0_i32 = arith.constant 0 : i32
    %c0_i32_0 = arith.constant 0 : i32
    return %c0_i32, %arg0 : i32, i32
  }
}

</mosaic_0001>

<bundles_post_ra>
// kernel: mlp_forward.1
= control target key start
LH: loop header
LB: loop body
LE: loop exit
PB: predicated region body
PF: predicated region fallthrough
CT: control target
= control target key end

     0   :  { %vm37_vm0 = vcmask 130048   ;;  %v618_v3 = vmov 80   ;;  %v619_v7 = vmov 81   ;;  %v620_v8 = vmov 82   ;;  %s625_s20 = smov 80   ;;  %s721_s0 = inlined_call_operand.vmem [shape: f32[16,128], index: 0, kind: input, shape index: {}]   ;;  %s722_s1 = inlined_call_operand.vmem [shape: f32[32,87], index: 1, kind: input, shape index: {}]   ;;  %s723_s2 = inlined_call_operand.vmem [shape: f32[8,128], index: 2, kind: output, shape index: {}]  }
   0x1   :  { %v16_v0 = vld [vmem:[%s721_s0 + $0x8] sm:$0xff]  ;;  %v15_v1 = vld [vmem:[%s721_s0] sm:$0xff]  ;;  %596 = vset.pattern.permute.xlu0 %v618_v3  ;;  %597 = vset.pattern.permute.xlu1 %v618_v3  ;;  %v663_v5 = vld [vmem:[%s722_s1 + $0x10] sm:$0xff]  ;;  %vm234_vm1 = vcmask 261120   ;;  %v622_v16 = vmov 83   ;;  %v623_v17 = vmov 84  }
   0x2   :  { %v651_v2 = vld [vmem:[%s722_s1] sm:$0xff]  ;;  %549 = vmatprep.subr.mxu0 %v16_v0  ;;  %v658_v4 = vld [vmem:[%s722_s1 + $0x8] sm:$0xff]  ;;  %29 = vperm.xlu1 %597, %v663_v5   ;;  %v14_v6 = vld [vmem:[%s722_s1 + $0x18] sm:$0xff]  ;;  %s621_s1 = smov 112   ;;  %v624_v18 = vmov 85  }
   0x3   :  { %553 = vmatprep.mubr.msk.f32.mxu0 %vm37_vm0, %v651_v2  ;;  %550 = vmatpush3.msra.mxu0 %v16_v0 }
   0x4   :  { %19 = vperm.xlu0 %596, %v651_v2   ;;  %551 = vmatprep.subr.mxu0 %v15_v1 }
   0x5   :  { %552 = vmatpush3.msra.mxu0 %v15_v1 }
   0x6   :  { %554 = vmatmul.mubr.msk.f32.vlgmr.msra.gmra.mxu0 %vm37_vm0, %v658_v4  ;;  %34 = vperm.xlu1 %597, %v14_v6  }
   0x7   :  { %556 = vmatprep.mubr.msk.f32.mxu0 %vm37_vm0, %v663_v5 }
   0x8   :  { %24 = vperm.xlu0 %596, %v658_v4  }
   0xa   :  { %557 = vmatmul.mubr.msk.f32.gmra.mxu0 %vm37_vm0, %v14_v6  ;;  %599 = vset.pattern.permute.xlu1 %v619_v7 }
   0xb   :  { %175 = vperm.xlu1 %599, %v663_v5  }
   0xc   :  { %598 = vset.pattern.permute.xlu0 %v619_v7 }
   0xd   :  { %179 = vperm.xlu0 %598, %v14_v6  }
   0xf   :  { %600 = vset.pattern.permute.xlu1 %v620_v8 }
  0x10   :  { %199 = vperm.xlu1 %600, %v14_v6  }
  0x11   :  { %171 = vperm.xlu0 %598, %v658_v4  }
  0x14   :  { %195 = vperm.xlu1 %600, %v663_v5  }
  0x15   :  { %167 = vperm.xlu0 %598, %v651_v2  }
  0x18   :  { %191 = vperm.xlu1 %600, %v658_v4  }
  0x19   :  { %601 = vset.pattern.permute.xlu0 %v620_v8 }
  0x1a   :  { %187 = vperm.xlu0 %601, %v651_v2  }
  0x1c   :  { %226 = vrot.lane.b32.xlu1 %v651_v2, %s621_s1 }
  0x1d   :  { %603 = vset.pattern.permute.xlu1 %v622_v16 }
  0x1e   :  { %230 = vrot.lane.b32.xlu0 %v663_v5, %s621_s1 }
  0x1f   :  { %602 = vset.pattern.permute.xlu0 %v622_v16 }
  0x20   :  { %228 = vrot.lane.b32.xlu1 %v658_v4, %s621_s1 }
  0x22   :  { %211 = vperm.xlu0 %602, %v651_v2  }
  0x24   :  { %232 = vrot.lane.b32.xlu1 %v14_v6, %s621_s1 }
  0x26   :  { %223 = vperm.xlu0 %602, %v14_v6  }
  0x28   :  { %215 = vperm.xlu1 %603, %v658_v4  }
  0x2a   :  { %605 = vset.pattern.permute.xlu0 %v623_v17 }
  0x2b   :  { %371 = vperm.xlu0 %605, %v663_v5  }
  0x2c   :  { %219 = vperm.xlu1 %603, %v663_v5  }
  0x2f   :  { %608 = vset.pattern.permute.xlu0 %v624_v18 }
  0x30   :  { %604 = vset.pattern.permute.xlu1 %v623_v17  ;;  %391 = vperm.xlu0 %608, %v663_v5  }
  0x31   :  { %375 = vperm.xlu1 %604, %v14_v6  }
  0x34   :  { %383 = vperm.xlu0 %608, %v651_v2  }
  0x35   :  { %606 = vset.pattern.permute.xlu1 %v624_v18 }
  0x36   :  { %395 = vperm.xlu1 %606, %v14_v6  }
  0x38   :  { %408 = vrot.lane.b32.xlu0 %v658_v4, %s625_s20 }
  0x3a   :  { %607 = vset.pattern.permute.xlu1 %v623_v17 }
  0x3b   :  { %367 = vperm.xlu1 %607, %v658_v4  }
  0x3c   :  { %412 = vrot.lane.b32.xlu0 %v14_v6, %s625_s20 }
  0x3f   :  { %363 = vperm.xlu1 %607, %v651_v2  }
  0x43   :  { %609 = vset.pattern.permute.xlu1 %v624_v18 }
  0x44   :  { %387 = vperm.xlu1 %609, %v658_v4  }
  0x48   :  { %406 = vrot.lane.b32.xlu1 %v651_v2, %s625_s20 }
  0x4c   :  { %410 = vrot.lane.b32.xlu1 %v663_v5, %s625_s20 }
  0x7d   :  { %v30_v9 = vpop.permute.xlu1 %29 }
  0x7f   :  { %v20_v19 = vpop.permute.xlu0 %19 }
  0x81   :  { %v35_v10 = vpop.permute.xlu1 %34 }
  0x83   :  { %v25_v21 = vpop.permute.xlu0 %24 }
  0x86   :  { %v685_v11 = vpop.permute.xlu1 %175 }
  0x88   :  { %v180_v58 = vpop.permute.xlu0 %179 }
  0x8b   :  { %v687_v12 = vpop.permute.xlu1 %199 }
  0x8c   :  { %v172_v59 = vpop.permute.xlu0 %171 }
  0x8f   :  { %v689_v13 = vpop.permute.xlu1 %195 }
  0x90   :  { %v168_v1 = vpop.permute.xlu0 %167 }
  0x93   :  { %v691_v14 = vpop.permute.xlu1 %191 }
  0x97   :  { %v227_v15 = vpop.permute.xlu1 %226 }
  0x98   :  { %567 = vmatprep.mubr.msk.f32.mxu1 %vm234_vm1, %v227_v15 }
  0xc6   :  { %v555_v20 = vpop.f32.mrf.mxu0 }
  0xc7   :  { %v118_v25 = vadd.f32 %v555_v20, %v25_v21 }
  0xc8   :  { %v112_v22 = vpop.f32.mrf.mxu0 }
  0xc9   :  { %v113_v23 = vadd.f32 %v112_v22, %v20_v19  ;;  %v229_v19 = vpop.permute.xlu1 %228 }
  0xca   :  { %v558_v24 = vpop.f32.mrf.mxu0 }
  0xcb   :  { %v131_v27 = vadd.f32 %v118_v25, %v113_v23  ;;  %v128_v29 = vadd.f32 %v558_v24, %v35_v10 }
  0xcc   :  { %v122_v26 = vpop.f32.mrf.mxu0 }
  0xcd   :  { %v123_v28 = vadd.f32 %v122_v26, %v30_v9  ;;  %v188_v9 = vpop.permute.xlu0 %187 }
  0xcf   :  { %v132_v30 = vadd.f32 %v131_v27, %v123_v28  ;;  %v626_v27 = vmov 86  }
  0xd0   :  { %610 = vset.pattern.permute.xlu1 %v626_v27  ;;  %611 = vset.pattern.permute.xlu0 %v626_v27 }
  0xd1   :  { %v133_v31 = vadd.f32 %v132_v30, %v128_v29  ;;  %505 = vperm.xlu1 %610, %v651_v2  }
  0xd3   :  { %v134_v32 = vrot.slane %v133_v31, 4 }
  0xd5   :  { %v135_v33 = vadd.f32 %v134_v32, %v133_v31 }
  0xd7   :  { %v136_v34 = vrot.slane %v135_v33, 2 }
  0xd9   :  { %v137_v35 = vadd.f32 %v136_v34, %v135_v33 }
  0xdb   :  { %v138_v36 = vrot.slane %v137_v35, 1 }
  0xdd   :  { %v139_v37 = vadd.f32 %v138_v36, %v137_v35 }
  0xdf   :  { %v141_v38 = vmul.f32 0.03125, %v139_v37 }
  0xe1   :  { %v142_v39 = vsub.f32 %v113_v23, %v141_v38  ;;  %v143_v40 = vsub.f32 %v118_v25, %v141_v38  ;;  %v144_v41 = vsub.f32 %v123_v28, %v141_v38  ;;  %v145_v42 = vsub.f32 %v128_v29, %v141_v38 }
  0xe3   :  { %v146_v43 = vmul.f32 %v142_v39, %v142_v39  ;;  %v147_v44 = vmul.f32 %v143_v40, %v143_v40  ;;  %v148_v45 = vmul.f32 %v144_v41, %v144_v41  ;;  %v149_v47 = vmul.f32 %v145_v42, %v145_v42 }
  0xe5   :  { %v150_v46 = vadd.f32 %v147_v44, %v146_v43 }
  0xe7   :  { %v151_v48 = vadd.f32 %v150_v46, %v148_v45 }
  0xe9   :  { %v152_v49 = vadd.f32 %v151_v48, %v149_v47 }
  0xeb   :  { %v153_v50 = vrot.slane %v152_v49, 4 }
  0xed   :  { %v154_v51 = vadd.f32 %v153_v50, %v152_v49 }
  0xef   :  { %v155_v52 = vrot.slane %v154_v51, 2 }
  0xf1   :  { %v156_v53 = vadd.f32 %v155_v52, %v154_v51 }
  0xf3   :  { %v157_v54 = vrot.slane %v156_v53, 1 }
  0xf5   :  { %v158_v55 = vadd.f32 %v157_v54, %v156_v53 }
  0xf7   :  { %v159_v56 = vmul.f32 0.03125, %v158_v55 }
  0xf9   :  { %v160_v57 = vadd.f32 1e-05, %v159_v56 }
  0xfb   :  { %612 = vrsqrt.f32 %v160_v57 }
 0x108   :  { %v613_v60 = vpop.eup %612 }
 0x109   :  { %v164_v61 = vmul.f32 %v613_v60, %v144_v41  ;;  %v165_v62 = vmul.f32 %v613_v60, %v145_v42  ;;  %v163_v63 = vmul.f32 %v613_v60, %v143_v40  ;;  %v162_v0 = vmul.f32 %v613_v60, %v142_v39 }
 0x10b   :  { %v184_v3 = vmul.f32 %v685_v11, %v164_v61  ;;  %v185_v4 = vmul.f32 %v180_v58, %v165_v62  ;;  %v183_v5 = vmul.f32 %v172_v59, %v163_v63  ;;  %v182_v8 = vmul.f32 %v168_v1, %v162_v0 }
 0x10d   :  { %v205_v6 = vadd.f32 %v687_v12, %v185_v4  ;;  %v204_v7 = vadd.f32 %v689_v13, %v184_v3  ;;  %v203_v15 = vadd.f32 %v691_v14, %v183_v5  ;;  %v202_v17 = vadd.f32 %v188_v9, %v182_v8  ;;  %v231_v12 = vpop.permute.xlu0 %230  ;;  %v233_v13 = vpop.permute.xlu1 %232 }
 0x10f   :  { %v209_v10 = vmax.f32 %v205_v6, 0.0  ;;  %v208_v16 = vmax.f32 %v204_v7, 0.0  ;;  %v207_v18 = vmax.f32 %v203_v15, 0.0  ;;  %v206_v11 = vmax.f32 %v202_v17, 0.0 }
 0x111   :  { %559 = vmatprep.subr.mxu1 %v209_v10  ;;  %v216_v14 = vpop.permute.xlu1 %215  ;;  %v212_v28 = vpop.permute.xlu0 %211 }
 0x112   :  { %560 = vmatpush3.msra.mxu1 %v209_v10 }
 0x113   :  { %561 = vmatprep.subr.mxu1 %v208_v16 }
 0x114   :  { %562 = vmatpush3.msra.mxu1 %v208_v16 }
 0x115   :  { %563 = vmatprep.subr.mxu1 %v207_v18  ;;  %v220_v20 = vpop.permute.xlu1 %219  ;;  %v224_v34 = vpop.permute.xlu0 %223 }
 0x116   :  { %564 = vmatpush3.msra.mxu1 %v207_v18 }
 0x117   :  { %565 = vmatprep.subr.mxu1 %v206_v11 }
 0x118   :  { %566 = vmatpush3.msra.mxu1 %v206_v11 }
 0x119   :  { %568 = vmatmul.mubr.msk.f32.vlgmr.msra.gmra.mxu1 %vm234_vm1, %v229_v19  ;;  %v376_v21 = vpop.permute.xlu1 %375  ;;  %v372_v3 = vpop.permute.xlu0 %371 }
 0x11a   :  { %570 = vmatprep.mubr.msk.f32.mxu1 %vm234_vm1, %v231_v12 }
 0x11d   :  { %571 = vmatmul.mubr.msk.f32.gmra.mxu1 %vm234_vm1, %v233_v13  ;;  %v396_v22 = vpop.permute.xlu1 %395  ;;  %v392_v5 = vpop.permute.xlu0 %391 }
 0x121   :  { %v368_v23 = vpop.permute.xlu1 %367  ;;  %v384_v11 = vpop.permute.xlu0 %383 }
 0x125   :  { %v364_v24 = vpop.permute.xlu1 %363 }
 0x129   :  { %v388_v25 = vpop.permute.xlu1 %387 }
 0x12d   :  { %v407_v26 = vpop.permute.xlu1 %406 }
 0x12e   :  { %581 = vmatprep.mubr.msk.f32.mxu0 %vm234_vm1, %v407_v26 }
 0x1d9   :  { %v569_v29 = vpop.f32.mrf.mxu1 }
 0x1da   :  { %v315_v33 = vadd.f32 %v569_v29, %v216_v14 }
 0x1db   :  { %v309_v30 = vpop.f32.mrf.mxu1 }
 0x1dc   :  { %v310_v31 = vadd.f32 %v309_v30, %v212_v28  ;;  %v409_v28 = vpop.permute.xlu0 %408 }
 0x1dd   :  { %v572_v32 = vpop.f32.mrf.mxu1 }
 0x1de   :  { %v328_v36 = vadd.f32 %v315_v33, %v310_v31  ;;  %v325_v38 = vadd.f32 %v572_v32, %v224_v34 }
 0x1df   :  { %v319_v35 = vpop.f32.mrf.mxu1 }
 0x1e0   :  { %v320_v37 = vadd.f32 %v319_v35, %v220_v20 }
 0x1e2   :  { %v329_v39 = vadd.f32 %v328_v36, %v320_v37 }
 0x1e4   :  { %v330_v40 = vadd.f32 %v329_v39, %v325_v38 }
 0x1e6   :  { %v331_v41 = vrot.slane %v330_v40, 4 }
 0x1e8   :  { %v332_v42 = vadd.f32 %v331_v41, %v330_v40 }
 0x1ea   :  { %v333_v43 = vrot.slane %v332_v42, 2 }
 0x1ec   :  { %v334_v44 = vadd.f32 %v333_v43, %v332_v42 }
 0x1ee   :  { %v335_v45 = vrot.slane %v334_v44, 1 }
 0x1f0   :  { %v336_v46 = vadd.f32 %v335_v45, %v334_v44 }
 0x1f2   :  { %v337_v2 = vmul.f32 0.03125, %v336_v46 }
 0x1f4   :  { %v338_v47 = vsub.f32 %v310_v31, %v337_v2  ;;  %v339_v48 = vsub.f32 %v315_v33, %v337_v2  ;;  %v340_v49 = vsub.f32 %v320_v37, %v337_v2  ;;  %v341_v52 = vsub.f32 %v325_v38, %v337_v2 }
 0x1f6   :  { %v342_v50 = vmul.f32 %v338_v47, %v338_v47  ;;  %v343_v51 = vmul.f32 %v339_v48, %v339_v48  ;;  %v344_v53 = vmul.f32 %v340_v49, %v340_v49  ;;  %v345_v56 = vmul.f32 %v341_v52, %v341_v52 }
 0x1f8   :  { %v346_v54 = vadd.f32 %v343_v51, %v342_v50 }
 0x1fa   :  { %v347_v55 = vadd.f32 %v346_v54, %v344_v53 }
 0x1fc   :  { %v348_v57 = vadd.f32 %v347_v55, %v345_v56 }
 0x1fe   :  { %v349_v58 = vrot.slane %v348_v57, 4 }
 0x200   :  { %v350_v59 = vadd.f32 %v349_v58, %v348_v57 }
 0x202   :  { %v351_v60 = vrot.slane %v350_v59, 2 }
 0x204   :  { %v352_v61 = vadd.f32 %v351_v60, %v350_v59 }
 0x206   :  { %v353_v62 = vrot.slane %v352_v61, 1 }
 0x208   :  { %v354_v63 = vadd.f32 %v353_v62, %v352_v61 }
 0x20a   :  { %v355_v0 = vmul.f32 0.03125, %v354_v63 }
 0x20c   :  { %v356_v1 = vadd.f32 1e-05, %v355_v0 }
 0x20e   :  { %614 = vrsqrt.f32 %v356_v1 }
 0x21b   :  { %v615_v4 = vpop.eup %614 }
 0x21c   :  { %v361_v6 = vmul.f32 %v615_v4, %v341_v52  ;;  %v359_v7 = vmul.f32 %v615_v4, %v339_v48  ;;  %v360_v8 = vmul.f32 %v615_v4, %v340_v49  ;;  %v358_v9 = vmul.f32 %v615_v4, %v338_v47 }
 0x21e   :  { %v381_v10 = vmul.f32 %v376_v21, %v361_v6  ;;  %v379_v15 = vmul.f32 %v368_v23, %v359_v7  ;;  %v380_v16 = vmul.f32 %v372_v3, %v360_v8  ;;  %v378_v18 = vmul.f32 %v364_v24, %v358_v9  ;;  %v411_v21 = vpop.permute.xlu1 %410 }
 0x220   :  { %v401_v17 = vadd.f32 %v396_v22, %v381_v10  ;;  %v400_v19 = vadd.f32 %v392_v5, %v380_v16  ;;  %v399_v13 = vadd.f32 %v388_v25, %v379_v15  ;;  %v398_v20 = vadd.f32 %v384_v11, %v378_v18  ;;  %v413_v22 = vpop.permute.xlu0 %412 }
 0x222   :  { %v405_v12 = vmax.f32 %v401_v17, 0.0  ;;  %v404_v14 = vmax.f32 %v400_v19, 0.0  ;;  %v403_v26 = vmax.f32 %v399_v13, 0.0  ;;  %v402_v27 = vmax.f32 %v398_v20, 0.0  ;;  %v506_v24 = vpop.permute.xlu1 %505 }
 0x224   :  { %573 = vmatprep.subr.mxu0 %v405_v12 }
 0x225   :  { %574 = vmatpush3.msra.mxu0 %v405_v12 }
 0x226   :  { %575 = vmatprep.subr.mxu0 %v404_v14 }
 0x227   :  { %576 = vmatpush3.msra.mxu0 %v404_v14 }
 0x228   :  { %577 = vmatprep.subr.mxu0 %v403_v26 }
 0x229   :  { %578 = vmatpush3.msra.mxu0 %v403_v26 }
 0x22a   :  { %579 = vmatprep.subr.mxu0 %v402_v27 }
 0x22b   :  { %580 = vmatpush3.msra.mxu0 %v402_v27 }
 0x22c   :  { %582 = vmatmul.mubr.msk.f32.vlgmr.msra.gmra.mxu0 %vm234_vm1, %v409_v28 }
 0x22d   :  { %584 = vmatprep.mubr.msk.f32.mxu0 %vm234_vm1, %v411_v21 }
 0x230   :  { %585 = vmatmul.mubr.msk.f32.gmra.mxu0 %vm234_vm1, %v413_v22 }
 0x2ec   :  { %v583_v23 = vpop.f32.mrf.mxu0 }
 0x2ee   :  { %v488_v25 = vpop.f32.mrf.mxu0 }
 0x2ef   :  { %v508_v29 = vadd.f32 %v506_v24, %v488_v25 }
 0x2f0   :  { %v586_v30 = vpop.f32.mrf.mxu0 }
 0x2f1   :  { %616 = vtanh.f32 %v508_v29 }
 0x2f2   :  { %v497_v31 = vpop.f32.mrf.mxu0 }
 0x2fe   :  { %v617_v32 = vpop.eup %616 }
 0x2ff   :  { %510 = vst [vmem:[%s723_s2] sm:$0xff] %v617_v32 }

</bundles_post_ra>
